<compile_context>
chip_gen: v7x
topology: tpu7x:2x2x1
jax: 0.10.0
libtpu: 0.0.40
codegen_flags: <defaults>
</compile_context>

<pallas_src>
import functools

import jax
import jax.numpy as jnp
from jax.experimental import pallas as pl
from jax.experimental.pallas import tpu as pltpu

_LANE = 128      # lane width (last dim)
_TB_ALIGN = 16   # batch-tile alignment (bf16 output sublane packing; also /8)


def _round_up(n, m):
    return ((n + m - 1) // m) * m


def _cdiv(a, b):
    return -(-a // b)


def mld_kernel(x_ref, w1_ref, b1_ref, w2_ref, b2_ref, w3_ref, b3_ref, o_ref):
    # x tile: (TB, in_size) f32 -> cast to bf16 here (no wrapper-side copy).
    x = x_ref[...].astype(jnp.bfloat16)

    h = jnp.dot(x, w1_ref[...], preferred_element_type=jnp.float32) + b1_ref[...]
    h = jnp.maximum(h, 0.5 * h)                       # leaky_relu, slope 0.5

    h = jnp.dot(h.astype(jnp.bfloat16), w2_ref[...],
                preferred_element_type=jnp.float32) + b2_ref[...]
    h = jnp.maximum(h, 0.5 * h)

    h = jnp.dot(h.astype(jnp.bfloat16), w3_ref[...],
                preferred_element_type=jnp.float32) + b3_ref[...]

    # Exact sigmoid: exp goes to the EUP; the true divide keeps the result in
    # [0,1] (approx reciprocal could overshoot slightly).
    o_ref[...] = (1.0 / (1.0 + jnp.exp(-h))).astype(o_ref.dtype)


def prepare_params(params):
    """One-time (outside jit) lane-padding + bf16 cast of weights/biases.

    Zero-padding preserves semantics exactly: padded hidden columns get bias 0
    (leaky_relu(0)=0) and padded w2/w3 rows contribute nothing; padded output
    columns are sliced off by the wrapper.
    """
    in_size, hidden = params["w1"].shape
    out_size = params["w3"].shape[1]
    hid_p = _round_up(hidden, _LANE)
    out_p = _round_up(out_size, _LANE)

    w1 = jnp.zeros((in_size, hid_p), jnp.bfloat16).at[:, :hidden].set(
        params["w1"].astype(jnp.bfloat16))
    w2 = jnp.zeros((hid_p, hid_p), jnp.bfloat16).at[:hidden, :hidden].set(
        params["w2"].astype(jnp.bfloat16))
    w3 = jnp.zeros((hid_p, out_p), jnp.bfloat16).at[:hidden, :out_size].set(
        params["w3"].astype(jnp.bfloat16))
    b1 = jnp.zeros((1, hid_p), jnp.float32).at[0, :hidden].set(params["b1"])
    b2 = jnp.zeros((1, hid_p), jnp.float32).at[0, :hidden].set(params["b2"])
    b3 = jnp.zeros((1, out_p), jnp.float32).at[0, :out_size].set(params["b3"])
    return {"w1": w1, "b1": b1, "w2": w2, "b2": b2, "w3": w3, "b3": b3}


@functools.partial(jax.jit, static_argnames=("out_size", "block_b"))
def multilayer_discriminator(x, prepared, *, out_size, block_b=1024):
    """x: (B, input_size) f32. prepared: output of prepare_params."""
    B, in_size = x.shape
    hid_p = prepared["w1"].shape[1]
    out_p = prepared["w3"].shape[1]
    assert prepared["w1"].shape[0] == in_size

    # Balanced batch tiles (minimize pad waste when B % block_b != 0),
    # rounded to a multiple of 16 for bf16-output sublane packing.
    block_b = max(_TB_ALIGN, _round_up(block_b, _TB_ALIGN))
    nb = max(1, _cdiv(B, block_b))
    tb = _round_up(_cdiv(B, nb), _TB_ALIGN)
    b_p = nb * tb

    # Only a cheap row-pad (no lane pad, no dtype change) and only if needed.
    xp = x if b_p == B else jnp.pad(x, ((0, b_p - B), (0, 0)))

    # Resident operands: same block every grid step, single-buffered.
    def resident(shape):
        return pl.BlockSpec(shape, lambda *_: (0,) * len(shape),
                            pipeline_mode=pl.Buffered(1))

    # VMEM limit clamped to the generation's real capacity (v7x: 64 MiB/TC).
    try:
        vmem_cap = int(getattr(pltpu.get_tpu_info(), "vmem_capacity_bytes",
                               64 * 1024 * 1024))
    except Exception:  # pragma: no cover - defensive fallback
        vmem_cap = 64 * 1024 * 1024
    needed = (2 * tb * in_size * 4                                   # x (2 bufs, f32)
              + 2 * tb * out_p * 2                                   # out (2 bufs, bf16)
              + (in_size * hid_p + hid_p * hid_p + hid_p * out_p) * 2  # weights (1 buf)
              + (2 * hid_p + out_p) * 4                              # biases
              + 4 * tb * hid_p * 4)                                  # f32 intermediates
    vmem_limit = int(min(max(32 * 1024 * 1024, 2 * needed),
                         int(0.875 * vmem_cap)))

    flops = 2 * b_p * (in_size * hid_p + hid_p * hid_p + hid_p * out_p)
    bytes_accessed = (b_p * in_size * 4
                      + (in_size * hid_p + hid_p * hid_p + hid_p * out_p) * 2
                      + (2 * hid_p + out_p) * 4
                      + b_p * out_p * 2)

    out_padded = pl.pallas_call(
        mld_kernel,
        out_shape=jax.ShapeDtypeStruct((b_p, out_p), jnp.bfloat16),
        grid=(nb,),
        in_specs=[
            pl.BlockSpec((tb, in_size), lambda i: (i, 0)),   # x streamed over batch
            resident((in_size, hid_p)),
            resident((1, hid_p)),
            resident((hid_p, hid_p)),
            resident((1, hid_p)),
            resident((hid_p, out_p)),
            resident((1, out_p)),
        ],
        out_specs=pl.BlockSpec((tb, out_p), lambda i: (i, 0)),
        compiler_params=pltpu.CompilerParams(
            dimension_semantics=("parallel",),   # batch axis -> both TCs on v7x
            vmem_limit_bytes=vmem_limit,
        ),
        cost_estimate=pl.CostEstimate(
            flops=flops,
            transcendentals=b_p * out_p,
            bytes_accessed=bytes_accessed,
        ),
    )(xp, prepared["w1"], prepared["b1"], prepared["w2"], prepared["b2"],
      prepared["w3"], prepared["b3"])

    return out_padded[:B, :out_size].astype(jnp.float32)


def init_params(key, input_size, hidden_size, output_size):
    # Deterministic synthetic init (mimics PyTorch Linear uniform init bounds).
    ks = jax.random.split(key, 6)

    def lin(kw, kb, fan_in, fan_out):
        bound = 1.0 / jnp.sqrt(fan_in)
        w = jax.random.uniform(kw, (fan_in, fan_out), jnp.float32, -bound, bound)
        b = jax.random.uniform(kb, (fan_out,), jnp.float32, -bound, bound)
        return w, b

    w1, b1 = lin(ks[0], ks[1], input_size, hidden_size)
    w2, b2 = lin(ks[2], ks[3], hidden_size, hidden_size)
    w3, b3 = lin(ks[4], ks[5], hidden_size, output_size)
    return {"w1": w1, "b1": b1, "w2": w2, "b2": b2, "w3": w3, "b3": b3}


def reference(x, p):
    h = x @ p["w1"] + p["b1"]
    h = jnp.where(h >= 0, h, 0.5 * h)
    h = h @ p["w2"] + p["b2"]
    h = jnp.where(h >= 0, h, 0.5 * h)
    h = h @ p["w3"] + p["b3"]
    return jax.nn.sigmoid(h)


if __name__ == "__main__":
    key = jax.random.PRNGKey(0)
    k_x, k_p = jax.random.split(key)

    batch, input_size, hidden_size, output_size = 8, 16, 32, 8
    x = jax.random.normal(k_x, (batch, input_size), jnp.float32)
    params = init_params(k_p, input_size, hidden_size, output_size)

    # Weights are padded / cast to bf16 exactly once, outside the jitted call.
    prepared = prepare_params(params)

    out = multilayer_discriminator(x, prepared, out_size=output_size)
    out = jax.block_until_ready(out)

    ref = reference(x, params)
    assert out.shape == (batch, output_size)
    # bf16 matmuls + bf16 output store -> compare against f32 reference with a
    # correspondingly loosened tolerance (tuned for this small config).
    assert jnp.allclose(out, ref, atol=2e-2, rtol=2e-2), "mismatch vs reference"
    print("KERNEL_OK")
</pallas_src>

<mosaic_0001>
module attributes {stable_mosaic.version = 11 : i64} {
  func.func @mld_kernel(%arg0: i32, %arg1: memref<16x16xf32, #tpu.memory_space<vmem>>, %arg2: memref<16x128xbf16, #tpu.memory_space<vmem>>, %arg3: memref<1x128xf32, #tpu.memory_space<vmem>>, %arg4: memref<128x128xbf16, #tpu.memory_space<vmem>>, %arg5: memref<1x128xf32, #tpu.memory_space<vmem>>, %arg6: memref<128x128xbf16, #tpu.memory_space<vmem>>, %arg7: memref<1x128xf32, #tpu.memory_space<vmem>>, %arg8: memref<16x128xbf16, #tpu.memory_space<vmem>>) attributes {dimension_semantics = [#tpu.dimension_semantics<parallel>], iteration_bounds = array<i64: 1>, scalar_prefetch = 0 : i64, scratch_operands = 0 : i64, tpu.core_type = #tpu.core_type<tc>, window_params = [{transform_indices = @transform_0, window_bounds = array<i64: 16, 16>}, {pipeline_mode = #tpu.pipeline_mode<synchronous>, transform_indices = @transform_1, window_bounds = array<i64: 16, 128>}, {pipeline_mode = #tpu.pipeline_mode<synchronous>, transform_indices = @transform_2, window_bounds = array<i64: 1, 128>}, {pipeline_mode = #tpu.pipeline_mode<synchronous>, transform_indices = @transform_3, window_bounds = array<i64: 128, 128>}, {pipeline_mode = #tpu.pipeline_mode<synchronous>, transform_indices = @transform_4, window_bounds = array<i64: 1, 128>}, {pipeline_mode = #tpu.pipeline_mode<synchronous>, transform_indices = @transform_5, window_bounds = array<i64: 128, 128>}, {pipeline_mode = #tpu.pipeline_mode<synchronous>, transform_indices = @transform_6, window_bounds = array<i64: 1, 128>}, {transform_indices = @transform_7, window_bounds = array<i64: 16, 128>}]} {
    %c0 = arith.constant 0 : index
    %c0_0 = arith.constant 0 : index
    %0 = vector.load %arg1[%c0, %c0_0] : memref<16x16xf32, #tpu.memory_space<vmem>>, vector<16x16xf32>
    %1 = arith.truncf %0 : vector<16x16xf32> to vector<16x16xbf16>
    %c0_1 = arith.constant 0 : index
    %c0_2 = arith.constant 0 : index
    %2 = vector.load %arg2[%c0_1, %c0_2] : memref<16x128xbf16, #tpu.memory_space<vmem>>, vector<16x128xbf16>
    %cst = arith.constant dense<0.000000e+00> : vector<16x128xf32>
    %3 = tpu.matmul %1, %2, %cst {dimension_numbers = #tpu.dot_dimension_numbers<[1], [0], [0], [1], [0, 0, 1, 1], [], []>} : vector<16x16xbf16>, vector<16x128xbf16>, vector<16x128xf32> -> vector<16x128xf32>
    %c0_3 = arith.constant 0 : index
    %c0_4 = arith.constant 0 : index
    %4 = vector.load %arg3[%c0_3, %c0_4] : memref<1x128xf32, #tpu.memory_space<vmem>>, vector<1x128xf32>
    %5 = vector.broadcast %4 : vector<1x128xf32> to vector<16x128xf32>
    %6 = arith.addf %3, %5 : vector<16x128xf32>
    %cst_5 = arith.constant 5.000000e-01 : f32
    %7 = vector.broadcast %cst_5 : f32 to vector<16x128xf32>
    %8 = arith.mulf %7, %6 : vector<16x128xf32>
    %9 = arith.maximumf %6, %8 : vector<16x128xf32>
    %10 = arith.truncf %9 : vector<16x128xf32> to vector<16x128xbf16>
    %c0_6 = arith.constant 0 : index
    %c0_7 = arith.constant 0 : index
    %11 = vector.load %arg4[%c0_6, %c0_7] : memref<128x128xbf16, #tpu.memory_space<vmem>>, vector<128x128xbf16>
    %cst_8 = arith.constant dense<0.000000e+00> : vector<16x128xf32>
    %12 = tpu.matmul %10, %11, %cst_8 {dimension_numbers = #tpu.dot_dimension_numbers<[1], [0], [0], [1], [0, 0, 1, 1], [], []>} : vector<16x128xbf16>, vector<128x128xbf16>, vector<16x128xf32> -> vector<16x128xf32>
    %c0_9 = arith.constant 0 : index
    %c0_10 = arith.constant 0 : index
    %13 = vector.load %arg5[%c0_9, %c0_10] : memref<1x128xf32, #tpu.memory_space<vmem>>, vector<1x128xf32>
    %14 = vector.broadcast %13 : vector<1x128xf32> to vector<16x128xf32>
    %15 = arith.addf %12, %14 : vector<16x128xf32>
    %cst_11 = arith.constant 5.000000e-01 : f32
    %16 = vector.broadcast %cst_11 : f32 to vector<16x128xf32>
    %17 = arith.mulf %16, %15 : vector<16x128xf32>
    %18 = arith.maximumf %15, %17 : vector<16x128xf32>
    %19 = arith.truncf %18 : vector<16x128xf32> to vector<16x128xbf16>
    %c0_12 = arith.constant 0 : index
    %c0_13 = arith.constant 0 : index
    %20 = vector.load %arg6[%c0_12, %c0_13] : memref<128x128xbf16, #tpu.memory_space<vmem>>, vector<128x128xbf16>
    %cst_14 = arith.constant dense<0.000000e+00> : vector<16x128xf32>
    %21 = tpu.matmul %19, %20, %cst_14 {dimension_numbers = #tpu.dot_dimension_numbers<[1], [0], [0], [1], [0, 0, 1, 1], [], []>} : vector<16x128xbf16>, vector<128x128xbf16>, vector<16x128xf32> -> vector<16x128xf32>
    %c0_15 = arith.constant 0 : index
    %c0_16 = arith.constant 0 : index
    %22 = vector.load %arg7[%c0_15, %c0_16] : memref<1x128xf32, #tpu.memory_space<vmem>>, vector<1x128xf32>
    %23 = vector.broadcast %22 : vector<1x128xf32> to vector<16x128xf32>
    %24 = arith.addf %21, %23 : vector<16x128xf32>
    %cst_17 = arith.constant 0.000000e+00 : f32
    %25 = vector.broadcast %cst_17 : f32 to vector<16x128xf32>
    %26 = arith.subf %25, %24 : vector<16x128xf32>
    %27 = math.exp %26 : vector<16x128xf32>
    %cst_18 = arith.constant 1.000000e+00 : f32
    %28 = vector.broadcast %cst_18 : f32 to vector<16x128xf32>
    %29 = arith.addf %28, %27 : vector<16x128xf32>
    %cst_19 = arith.constant 1.000000e+00 : f32
    %30 = vector.broadcast %cst_19 : f32 to vector<16x128xf32>
    %31 = arith.divf %30, %29 : vector<16x128xf32>
    %32 = arith.truncf %31 : vector<16x128xf32> to vector<16x128xbf16>
    %c0_20 = arith.constant 0 : index
    %c0_21 = arith.constant 0 : index
    %33 = vector.load %arg8[%c0_20, %c0_21] : memref<16x128xbf16, #tpu.memory_space<vmem>>, vector<16x128xbf16>
    tpu.vector_store %arg8[%c0_20, %c0_21], %32 {strides = array<i32>} : memref<16x128xbf16, #tpu.memory_space<vmem>>, vector<16x128xbf16>,
    return
  }
  func.func @transform_0(%arg0: i32) -> (i32, i32) {
    %c0_i32 = arith.constant 0 : i32
    %c0_i32_0 = arith.constant 0 : i32
    return %arg0, %c0_i32 : i32, i32
  }
  func.func @transform_1(%arg0: i32) -> (i32, i32) {
    %c0_i32 = arith.constant 0 : i32
    %c0_i32_0 = arith.constant 0 : i32
    %c0_i32_1 = arith.constant 0 : i32
    return %c0_i32, %c0_i32_0 : i32, i32
  }
  func.func @transform_2(%arg0: i32) -> (i32, i32) {
    %c0_i32 = arith.constant 0 : i32
    %c0_i32_0 = arith.constant 0 : i32
    %c0_i32_1 = arith.constant 0 : i32
    return %c0_i32, %c0_i32_0 : i32, i32
  }
  func.func @transform_3(%arg0: i32) -> (i32, i32) {
    %c0_i32 = arith.constant 0 : i32
    %c0_i32_0 = arith.constant 0 : i32
    %c0_i32_1 = arith.constant 0 : i32
    return %c0_i32, %c0_i32_0 : i32, i32
  }
  func.func @transform_4(%arg0: i32) -> (i32, i32) {
    %c0_i32 = arith.constant 0 : i32
    %c0_i32_0 = arith.constant 0 : i32
    %c0_i32_1 = arith.constant 0 : i32
    return %c0_i32, %c0_i32_0 : i32, i32
  }
  func.func @transform_5(%arg0: i32) -> (i32, i32) {
    %c0_i32 = arith.constant 0 : i32
    %c0_i32_0 = arith.constant 0 : i32
    %c0_i32_1 = arith.constant 0 : i32
    return %c0_i32, %c0_i32_0 : i32, i32
  }
  func.func @transform_6(%arg0: i32) -> (i32, i32) {
    %c0_i32 = arith.constant 0 : i32
    %c0_i32_0 = arith.constant 0 : i32
    %c0_i32_1 = arith.constant 0 : i32
    return %c0_i32, %c0_i32_0 : i32, i32
  }
  func.func @transform_7(%arg0: i32) -> (i32, i32) {
    %c0_i32 = arith.constant 0 : i32
    %c0_i32_0 = arith.constant 0 : i32
    return %arg0, %c0_i32 : i32, i32
  }
}

</mosaic_0001>

<bundles_post_ra>
// kernel: multilayer_discriminator.1
= control target key start
LH: loop header
LB: loop body
LE: loop exit
PB: predicated region body
PF: predicated region fallthrough
CT: control target
= control target key end

     0   :  { %12 = vsyncpa [#allocation3], 0  ;;  %s669_s0 = inlined_call_operand.vmem [shape: f32[16,16], index: 0, kind: input, shape index: {}]   ;;  %s670_s1 = inlined_call_operand.vmem [shape: bf16[16,128], index: 1, kind: input, shape index: {}]   ;;  %s671_s2 = inlined_call_operand.vmem [shape: f32[1,128], index: 2, kind: input, shape index: {}]   ;;  %s672_s3 = inlined_call_operand.hbm [shape: bf16[128,128], index: 3, kind: input, shape index: {}]   ;;  %s673_s4 = inlined_call_operand.vmem [shape: f32[1,128], index: 4, kind: input, shape index: {}]   ;;  %s674_s5 = inlined_call_operand.hbm [shape: bf16[128,128], index: 5, kind: input, shape index: {}]   ;;  %s675_s6 = inlined_call_operand.vmem [shape: f32[1,128], index: 6, kind: input, shape index: {}]   ;;  %s676_s7 = inlined_call_operand.vmem [shape: bf16[16,128], index: 7, kind: output, shape index: {}]  }
   0x1   :  { %13 = vsyncpa [#allocation5], 0  ;;  %s555_s24 = smov [#allocation2]   ;;  %s507_s28 = scalar_lea.hbm %s672_s3, 1024 }
   0x2   :  { %s25_s25 = sshll.u32 %s555_s24, 4  ;;  %p508_p0 = scmp.ne.s32.totalorder %s672_s3, %s507_s28  ;;  %s26_s25 = int_to_ptr.vmem [resolvable:$true] %s25_s25 }
   0x3   :  { %p511_p1 = scmp.lt.u32.totalorder %s507_s28, %s672_s3 }
   0x5   :  { %p513_p2 = pnand %p511_p1, %p508_p0 }
   0x7   :  { %516 = shalt.err (!%p513_p2)
}
   0x8   :  { %s517_s10 = scalar_lea.vmem %s26_s25, 1024  ;;  %p522_p4 = scmp.lt.s32.totalorder %s26_s25, %s26_s25 }
   0x9   :  { %p518_p3 = scmp.ne.s32.totalorder %s26_s25, %s517_s10  ;;  %p523_p5 = scmp.lt.s32.totalorder %s517_s10, %s517_s10 }
   0xb   :  { %p524_p6 = por %p523_p5, %p522_p4 }
   0xd   :  { %p525_p7 = pnand %p524_p6, %p518_p3 }
   0xf   :  { %528 = shalt.err (!%p525_p7)
}
  0x10   :  { %s556_s11 = smov 64   ;;  %s557_s12 = smov 4  }
  0x11   :  { %31 = dma.hbm_to_vmem [thread:$0]  %s672_s3, 1024, %s26_s25, [#allocation3], %s556_s11, %s556_s11, %s557_s12  }
  0x12   :  { %s558_s15 = smov [#allocation4]   ;;  %s529_s19 = scalar_lea.hbm %s674_s5, 1024 }
  0x13   :  { %s39_s16 = sshll.u32 %s558_s15, 4  ;;  %p530_p8 = scmp.ne.s32.totalorder %s674_s5, %s529_s19  ;;  %s40_s16 = int_to_ptr.vmem [resolvable:$true] %s39_s16 }
  0x14   :  { %p533_p9 = scmp.lt.u32.totalorder %s529_s19, %s674_s5 }
  0x16   :  { %p535_p10 = pnand %p533_p9, %p530_p8 }
  0x18   :  { %538 = shalt.err (!%p535_p10)
}
  0x19   :  { %s539_s24 = scalar_lea.vmem %s40_s16, 1024  ;;  %p544_p12 = scmp.lt.s32.totalorder %s40_s16, %s40_s16 }
  0x1a   :  { %p540_p11 = scmp.ne.s32.totalorder %s40_s16, %s539_s24  ;;  %p545_p13 = scmp.lt.s32.totalorder %s539_s24, %s539_s24 }
  0x1c   :  { %p546_p0 = por %p545_p13, %p544_p12 }
  0x1e   :  { %p547_p1 = pnand %p546_p0, %p540_p11 }
  0x20   :  { %550 = shalt.err (!%p547_p1)
}
  0x21   :  { %45 = dma.hbm_to_vmem [thread:$0]  %s674_s5, 1024, %s40_s16, [#allocation5], %s556_s11, %s556_s11, %s557_s12  }
  0x22   :  { %551 = dma.done.wait [#allocation3], 1024  }
  0x23   :  { %552 = vsyncadd [#allocation3], 4294966272 }
  0x24   :  { %553 = dma.done.wait [#allocation5], 1024  }
  0x25   :  { %554 = vsyncadd [#allocation5], 4294966272  ;;  %v559_v0 = vmov 0.0   ;;  %vm560_vm0 = vmmov 0   ;;  %v482_v1 = vld [vmem:[%s670_s1] sm:$0xff]   ;;  %v56_v3 = vld [vmem:[%s669_s0 + $0x8] sm:$0xff] }
  0x26   :  { %430 = vmatprep.subr.bf16.mxu0 %v559_v0  ;;  %432 = vmatprep.mubr.msk.bf16.mxu0 %vm560_vm0, %v559_v0  ;;  %v55_v2 = vld [vmem:[%s669_s0] sm:$0xff]  ;;  %vm73_vm1 = vcmask 130048   ;;  %v484_v6 = vld [vmem:[#allocation2 + $0x8] sm:$0xff]   ;;  %v485_v7 = vld [vmem:[#allocation2 + $0x10] sm:$0xff]  }
  0x27   :  { %436 = vmatprep.subr.bf16.mxu1 %v559_v0  ;;  %452 = vmatprep.mubr.msk.bf16.mxu1 %vm560_vm0, %v559_v0  ;;  %v57_v4 = vpack.c.bf16 %v56_v3, %v55_v2  ;;  %v483_v5 = vld [vmem:[#allocation2] sm:$0xff]   ;;  %v486_v8 = vld [vmem:[#allocation2 + $0x18] sm:$0xff]   ;;  %v488_v10 = vld [vmem:[#allocation2 + $0x28] sm:$0xff]  }
  0x28   :  { %431 = vmatpush3.bf16.msra.mxu0 %v482_v1  ;;  %437 = vmatpush3.bf16.msra.mxu1 %v483_v5  ;;  %v487_v9 = vld [vmem:[#allocation2 + $0x20] sm:$0xff]   ;;  %v489_v11 = vld [vmem:[#allocation2 + $0x30] sm:$0xff]   ;;  %v490_v12 = vld [vmem:[#allocation2 + $0x38] sm:$0xff]  }
  0x29   :  { %456 = vmatprep.subr.bf16.mxu0 %v559_v0  ;;  %438 = vmatprep.subr.bf16.mxu1 %v559_v0  ;;  %v491_v13 = vld [vmem:[#allocation4] sm:$0xff]   ;;  %v492_v14 = vld [vmem:[#allocation4 + $0x8] sm:$0xff]   ;;  %v493_v15 = vld [vmem:[#allocation4 + $0x10] sm:$0xff]  }
  0x2a   :  { %v494_v16 = vld [vmem:[#allocation4 + $0x18] sm:$0xff]   ;;  %v495_v17 = vld [vmem:[#allocation4 + $0x20] sm:$0xff]   ;;  %v496_v30 = vld [vmem:[#allocation4 + $0x28] sm:$0xff]  }
  0x2b   :  { %433 = vmatmul.mubr.msk.bf16.vlgmr.msra.gmra.mrb[0].mxu0 %vm73_vm1, %v57_v4  ;;  %v380_v18 = vld [vmem:[%s671_s2] ss:$0 sm:$0xff]  ;;  %v497_v31 = vld [vmem:[#allocation4 + $0x30] sm:$0xff]   ;;  %v498_v32 = vld [vmem:[#allocation4 + $0x38] sm:$0xff]  }
  0x2c   :  { %472 = vmatprep.mubr.msk.bf16.mxu0 %vm560_vm0, %v559_v0  ;;  %439 = vmatpush3.bf16.msra.mxu1 %v484_v6  ;;  %v383_v33 = vld [vmem:[%s673_s4] ss:$0 sm:$0xff] }
  0x2d   :  { %440 = vmatprep.subr.bf16.mxu1 %v559_v0  ;;  %457 = vmatpush3.bf16.msra.mxu0 %v491_v13  ;;  %v392_v45 = vld [vmem:[%s675_s6] ss:$0 sm:$0xff] }
  0x2e   :  { %458 = vmatprep.subr.bf16.mxu0 %v559_v0 }
  0x30   :  { %441 = vmatpush3.bf16.msra.mxu1 %v485_v7 }
  0x31   :  { %442 = vmatprep.subr.bf16.mxu1 %v559_v0  ;;  %459 = vmatpush3.bf16.msra.mxu0 %v492_v14 }
  0x32   :  { %460 = vmatprep.subr.bf16.mxu0 %v559_v0 }
  0x34   :  { %443 = vmatpush3.bf16.msra.mxu1 %v486_v8 }
  0x35   :  { %444 = vmatprep.subr.bf16.mxu1 %v559_v0  ;;  %461 = vmatpush3.bf16.msra.mxu0 %v493_v15 }
  0x36   :  { %462 = vmatprep.subr.bf16.mxu0 %v559_v0 }
  0x38   :  { %445 = vmatpush3.bf16.msra.mxu1 %v487_v9 }
  0x39   :  { %446 = vmatprep.subr.bf16.mxu1 %v559_v0  ;;  %463 = vmatpush3.bf16.msra.mxu0 %v494_v16 }
  0x3a   :  { %464 = vmatprep.subr.bf16.mxu0 %v559_v0 }
  0x3c   :  { %447 = vmatpush3.bf16.msra.mxu1 %v488_v10 }
  0x3d   :  { %448 = vmatprep.subr.bf16.mxu1 %v559_v0  ;;  %465 = vmatpush3.bf16.msra.mxu0 %v495_v17 }
  0x3e   :  { %466 = vmatprep.subr.bf16.mxu0 %v559_v0 }
  0x40   :  { %449 = vmatpush3.bf16.msra.mxu1 %v489_v11 }
  0x41   :  { %450 = vmatprep.subr.bf16.mxu1 %v559_v0  ;;  %467 = vmatpush3.bf16.msra.mxu0 %v496_v30 }
  0x42   :  { %468 = vmatprep.subr.bf16.mxu0 %v559_v0 }
  0x44   :  { %451 = vmatpush3.bf16.msra.mxu1 %v490_v12 }
  0x45   :  { %469 = vmatpush3.bf16.msra.mxu0 %v497_v31 }
  0x46   :  { %470 = vmatprep.subr.bf16.mxu0 %v559_v0 }
  0x49   :  { %471 = vmatpush3.bf16.msra.mxu0 %v498_v32 }
  0xfe   :  { %v111_v19 = vpop.f32.mrb[0].mxu0 }
  0xff   :  { %v112_v20 = vadd.f32 %v380_v18, %v111_v19  ;;  %v434_v21 = vpop.f32.mrb[1].mxu0 }
 0x100   :  { %v114_v22 = vpop.f32.mrb[2].mxu0 }
 0x101   :  { %v118_v23 = vmul.f32 0.5, %v112_v20  ;;  %v115_v24 = vadd.f32 %v380_v18, %v114_v22  ;;  %v435_v25 = vpop.f32.mrb[3].mxu0 }
 0x103   :  { %v119_v26 = vmul.f32 0.5, %v115_v24  ;;  %v120_v27 = vmax.f32 %v112_v20, %v118_v23 }
 0x105   :  { %v121_v28 = vmax.f32 %v115_v24, %v119_v26 }
 0x107   :  { %v122_v29 = vpack.c.bf16 %v121_v28, %v120_v27 }
 0x109   :  { %453 = vmatmul.mubr.bf16.vlgmr.msra.gmra.mrb[0].mxu1 %v122_v29 }
 0x1dc   :  { %v228_v34 = vpop.f32.mrb[0].mxu1 }
 0x1dd   :  { %v229_v35 = vadd.f32 %v383_v33, %v228_v34  ;;  %v454_v36 = vpop.f32.mrb[1].mxu1 }
 0x1de   :  { %v231_v37 = vpop.f32.mrb[2].mxu1 }
 0x1df   :  { %v235_v38 = vmul.f32 0.5, %v229_v35  ;;  %v232_v39 = vadd.f32 %v383_v33, %v231_v37  ;;  %v455_v40 = vpop.f32.mrb[3].mxu1 }
 0x1e1   :  { %v236_v41 = vmul.f32 0.5, %v232_v39  ;;  %v237_v42 = vmax.f32 %v229_v35, %v235_v38 }
 0x1e3   :  { %v238_v43 = vmax.f32 %v232_v39, %v236_v41 }
 0x1e5   :  { %v239_v44 = vpack.c.bf16 %v238_v43, %v237_v42 }
 0x1e7   :  { %473 = vmatmul.mubr.bf16.vlgmr.msra.gmra.mrb[4].mxu0 %v239_v44 }
 0x2ba   :  { %v345_v46 = vpop.f32.mrb[4].mxu0 }
 0x2bb   :  { %v346_v47 = vadd.f32 %v392_v45, %v345_v46  ;;  %v474_v48 = vpop.f32.mrb[5].mxu0 }
 0x2bc   :  { %v348_v49 = vpop.f32.mrb[6].mxu0 }
 0x2bd   :  { %v352_v50 = vsub.f32 0.0, %v346_v47  ;;  %v349_v51 = vadd.f32 %v392_v45, %v348_v49  ;;  %v475_v52 = vpop.f32.mrb[7].mxu0 }
 0x2bf   :  { %v354_v53 = vmul.f32 1.442695, %v352_v50  ;;  %v353_v54 = vsub.f32 0.0, %v349_v51 }
 0x2c1   :  { %499 = vpow2.f32 %v354_v53  ;;  %v356_v55 = vmul.f32 1.442695, %v353_v54 }
 0x2c3   :  { %501 = vpow2.f32 %v356_v55 }
 0x2cb   :  { %v500_v56 = vpop.eup %499 }
 0x2cc   :  { %v358_v57 = vadd.f32 1.0, %v500_v56 }
 0x2cd   :  { %v502_v58 = vpop.eup %501 }
 0x2ce   :  { %v359_v59 = vadd.f32 1.0, %v502_v58  ;;  %503 = vrcp.f32 %v358_v57 }
 0x2d0   :  { %505 = vrcp.f32 %v359_v59 }
 0x2d8   :  { %v504_v60 = vpop.eup %503 }
 0x2da   :  { %v506_v61 = vpop.eup %505 }
 0x2db   :  { %v408_v62 = vpack.c.bf16 %v506_v61, %v504_v60 }
 0x2dd   :  { %409 = vst [vmem:[%s676_s7] sm:$0xff] %v408_v62  }
 0x2de   :  { %378 = vsyncpa [#allocation3], 1 }
 0x2df   :  { %379 = vsyncpa [#allocation5], 1 }

</bundles_post_ra>
